<compile_context>
chip_gen: v7x
topology: tpu7x:2x2x1
jax: 0.10.0
libtpu: 0.0.40
codegen_flags: <defaults>
</compile_context>

<pallas_src>
import functools

import jax
import jax.numpy as jnp
from jax import lax
from jax.experimental import pallas as pl
from jax.experimental.pallas import tpu as pltpu


_SUPPORTED_BORDERS = ("reflect", "replicate", "circular", "constant")

_BORDER_TO_PAD_MODE = {
    "reflect": "reflect",
    "replicate": "edge",
    "circular": "wrap",
    "constant": "constant",
}


def _pad_src_indices(n, lo, hi, border_type):
    """Source index (into the unpadded axis of length n) for each pad position.

    Returns (left, right) lists of length lo / hi.  `None` means zero-fill.
    Matches jnp.pad reflect/edge/wrap/constant(0) == torch reflect / replicate /
    circular / constant, which is what kornia.filter2d uses.
    """
    if border_type == "reflect":
        left = [lo - p for p in range(lo)]
        right = [n - 2 - q for q in range(hi)]
    elif border_type == "replicate":
        left = [0] * lo
        right = [n - 1] * hi
    elif border_type == "circular":
        left = [n - lo + p for p in range(lo)]
        right = list(range(hi))
    elif border_type == "constant":
        left = [None] * lo
        right = [None] * hi
    else:
        raise ValueError(f"Unsupported border_type: {border_type!r}")
    return left, right


# ---------------------------------------------------------------------------
# Fast-path helpers: scratch-free shifted taps via XLU rolls + border selects.
# ---------------------------------------------------------------------------

def _take1(x, axis, idx):
    """Size-1 static slice along `axis` (kept dim, broadcasts inside jnp.where)."""
    if axis == 1:
        return x[:, idx:idx + 1, :]
    if axis == 2:
        return x[:, :, idx:idx + 1]
    raise ValueError(f"unsupported axis: {axis}")


def _shifted_tap_roll(x, d, axis, n, border_type):
    """result[..., i, ...] == border_padded(x)[..., i + d, ...] for d != 0.

    In-range positions come from a pltpu.roll (jnp.roll semantics:
    roll(x, s)[i] == x[(i - s) % n], hence shift = -d); only the |d|
    out-of-range positions at one edge are fixed up with iota-mask selects.
    """
    rolled = pltpu.roll(x, (-d) % n, axis)
    if border_type == "circular":
        return rolled  # the wrap-around is exactly what the roll produces
    idx = lax.broadcasted_iota(jnp.int32, x.shape, axis)
    if d < 0:
        oob = idx < -d  # i + d < 0
        if border_type == "constant":
            return jnp.where(oob, jnp.zeros_like(rolled), rolled)
        if border_type == "replicate":
            return jnp.where(oob, _take1(x, axis, 0), rolled)
        # reflect: padded[i + d] == x[-(i + d)]
        out = rolled
        for i in range(-d):
            out = jnp.where(idx == i, _take1(x, axis, -(i + d)), out)
        return out
    oob = idx >= n - d  # i + d >= n
    if border_type == "constant":
        return jnp.where(oob, jnp.zeros_like(rolled), rolled)
    if border_type == "replicate":
        return jnp.where(oob, _take1(x, axis, n - 1), rolled)
    # reflect: padded[i + d] == x[2*(n-1) - (i + d)]
    out = rolled
    for i in range(n - d, n):
        out = jnp.where(idx == i, _take1(x, axis, 2 * (n - 1) - (i + d)), out)
    return out


def _box_sum_axis_roll(x, axis, n, pad_lo, pad_hi, border_type):
    """sum_{d=-pad_lo..pad_hi} border_padded(x)[..., i + d, ...] along `axis`."""
    # TODO(synk): for ky/kx >~ 9 switch to a sliding-window running sum so the
    # VALU (no f32 FMA on v5e/v6e) stays off the critical path.
    acc = x
    for d in range(-pad_lo, pad_hi + 1):
        if d == 0:
            continue
        acc = acc + _shifted_tap_roll(x, d, axis, n, border_type)
    return acc


# ---------------------------------------------------------------------------
# Kernel body.
# ---------------------------------------------------------------------------

def _box_blur_kernel(x_ref, o_ref, *scratch, ky, kx, pads, border_type, scale,
                     use_roll):
    # x_ref : (BCt, H, W) input planes   [VMEM, auto-pipelined]
    # o_ref : (BCt, H, W) output planes  [VMEM, auto-pipelined]
    # scratch: () on the roll fast path, or a single (BCt, Hp, Wp) VMEM ref
    #          holding the border-padded planes on the unaligned fallback path.
    ph_lo, ph_hi, pw_lo, pw_hi = pads
    bct, H, W = x_ref.shape

    if use_roll:
        # ---- scratch-free fast path: XLU rolls + masked border selects ----
        x32 = x_ref[...].astype(jnp.float32)  # single f32 cast per plane
        hsum = _box_sum_axis_roll(x32, 2, W, pw_lo, pw_hi, border_type)
        acc = _box_sum_axis_roll(hsum, 1, H, ph_lo, ph_hi, border_type)
    else:
        # ---- fallback for non-(8,128)-aligned planes: padded VMEM scratch ----
        # TODO(synk): drop this path (it pays one extra in-VMEM store pass per
        # plane) once Mosaic's rotate supports unaligned last-two-dim shapes.
        xp_ref = scratch[0]
        Wp = W + kx - 1

        xp_ref[:, ph_lo:ph_lo + H, pw_lo:pw_lo + W] = x_ref[...]

        # Column (lane) borders for the H centre rows.
        w_left, w_right = _pad_src_indices(W, pw_lo, pw_hi, border_type)
        for p, src in enumerate(w_left):
            col = (jnp.zeros((bct, H, 1), xp_ref.dtype) if src is None
                   else x_ref[:, :, src:src + 1])
            xp_ref[:, ph_lo:ph_lo + H, p:p + 1] = col
        for q, src in enumerate(w_right):
            col = (jnp.zeros((bct, H, 1), xp_ref.dtype) if src is None
                   else x_ref[:, :, src:src + 1])
            dst = pw_lo + W + q
            xp_ref[:, ph_lo:ph_lo + H, dst:dst + 1] = col

        # Row (sublane) borders: copy full, already column-padded rows so the
        # corners come out right (2-D padding is separable for all 4 modes).
        # NOTE: these deliberately read xp_ref rows stored just above; same-ref
        # store->load within one kernel body is ordered.
        h_left, h_right = _pad_src_indices(H, ph_lo, ph_hi, border_type)
        for p, src in enumerate(h_left):
            row = (jnp.zeros((bct, 1, Wp), xp_ref.dtype) if src is None
                   else xp_ref[:, ph_lo + src:ph_lo + src + 1, :])
            xp_ref[:, p:p + 1, :] = row
        for q, src in enumerate(h_right):
            row = (jnp.zeros((bct, 1, Wp), xp_ref.dtype) if src is None
                   else xp_ref[:, ph_lo + src:ph_lo + src + 1, :])
            dst = ph_lo + H + q
            xp_ref[:, dst:dst + 1, :] = row

        # Separable box filter, f32 accumulation.
        hsum = xp_ref[:, :, 0:W].astype(jnp.float32)
        for j in range(1, kx):
            hsum = hsum + xp_ref[:, :, j:j + W].astype(jnp.float32)
        acc = hsum[:, 0:H, :]
        for i in range(1, ky):
            acc = acc + hsum[:, i:i + H, :]

    res = acc * scale
    if jnp.issubdtype(o_ref.dtype, jnp.integer):
        res = jnp.round(res)  # matches _reference_box_blur for integer dtypes
    o_ref[...] = res.astype(o_ref.dtype)


# ---------------------------------------------------------------------------
# Wrapper.
# ---------------------------------------------------------------------------

def _plane_vmem_bytes(rows, cols, dtype):
    """(sublane, 128)-tiled VMEM footprint of one (rows, cols) plane."""
    dt = jnp.dtype(dtype)
    sublane = max(8, 32 // dt.itemsize)  # 8 (f32/i32), 16 (bf16), 32 (i8)
    return (pl.cdiv(rows, sublane) * sublane) * (pl.cdiv(cols, 128) * 128) * dt.itemsize


def box_blur(x, kernel_size, border_type="reflect", normalized=True):
    """Pallas implementation of kornia.filters.box_blur for (B, C, H, W) inputs."""
    if x.ndim != 4:
        raise ValueError(f"expected (B, C, H, W) input, got shape {x.shape}")
    if border_type not in _SUPPORTED_BORDERS:
        raise ValueError(f"Unsupported border_type: {border_type!r}")
    B, C, H, W = x.shape
    ky, kx = kernel_size
    # kornia _compute_padding: total pad = k-1, rear = k//2, front = k-1-k//2.
    ph_lo, ph_hi = ky - 1 - ky // 2, ky // 2
    pw_lo, pw_hi = kx - 1 - kx // 2, kx // 2
    if border_type == "reflect" and (
            max(ph_lo, ph_hi) > H - 1 or max(pw_lo, pw_hi) > W - 1):
        raise ValueError("reflect padding requires pad < spatial dim (as in torch)")
    if border_type == "circular" and (
            max(ph_lo, ph_hi) > H or max(pw_lo, pw_hi) > W):
        raise ValueError("circular padding requires pad <= spatial dim")

    # The box kernel already has L1 norm 1, so `normalized` is a no-op
    # (kept for kornia API parity).
    del normalized
    scale = 1.0 / float(ky * kx)

    BC = B * C
    Hp, Wp = H + ky - 1, W + kx - 1
    xf = x.reshape(BC, H, W)

    # Mosaic's rotate currently needs the (f32) last-two dims (8,128)-aligned;
    # otherwise take the padded-scratch fallback.
    use_roll = (H % 8 == 0) and (W % 128 == 0)
    # TODO(synk): for W << 128 a lane-dense (H, W, BC) layout (BC on lanes)
    # would avoid masked vst.msk partial stores on every output row.

    # ---- size the per-step plane batch (bct) against the VMEM budget ----
    try:
        vmem_cap = int(pltpu.get_tpu_info().vmem_capacity_bytes)
    except Exception:  # query unavailable (e.g. interpret mode) -> conservative
        vmem_cap = 64 * 1024 * 1024
    vmem_limit = (vmem_cap * 3) // 4           # ~96 MiB v5e/v6e, ~48 MiB v7x
    block_budget = (vmem_limit * 85) // 100    # single hedge: ~85% of the limit

    per_plane = (
        2 * 2 * _plane_vmem_bytes(H, W, x.dtype)        # in+out, double-buffered
        + 3 * _plane_vmem_bytes(Hp, Wp, jnp.float32)    # live f32 intermediates
    )
    if not use_roll:
        per_plane += _plane_vmem_bytes(Hp, Wp, x.dtype)  # padded scratch plane
    bct = max(1, min(BC, block_budget // max(per_plane, 1)))
    if BC >= 2:
        # >= 2 grid steps so the 'parallel' axis can shard over v7x's two TCs.
        bct = min(bct, pl.cdiv(BC, 2))
    num_blocks = pl.cdiv(BC, bct)              # ragged tail handled by Pallas
    # TODO(synk): if a single plane exceeds the budget (e.g. >4K f32 frames on
    # v7x's 64 MiB VMEM), add an H-tiling grid axis with a (ky-1)-row halo.

    kernel = functools.partial(
        _box_blur_kernel, ky=ky, kx=kx,
        pads=(ph_lo, ph_hi, pw_lo, pw_hi),
        border_type=border_type, scale=scale, use_roll=use_roll)

    scratch_shapes = [] if use_roll else [pltpu.VMEM((bct, Hp, Wp), x.dtype)]

    out = pl.pallas_call(
        kernel,
        out_shape=jax.ShapeDtypeStruct((BC, H, W), x.dtype),
        grid_spec=pltpu.PrefetchScalarGridSpec(
            num_scalar_prefetch=0,
            grid=(num_blocks,),
            in_specs=[pl.BlockSpec((bct, H, W), lambda n: (n, 0, 0))],
            out_specs=pl.BlockSpec((bct, H, W), lambda n: (n, 0, 0)),
            scratch_shapes=scratch_shapes,
        ),
        compiler_params=pltpu.CompilerParams(
            dimension_semantics=("parallel",),
            vmem_limit_bytes=int(vmem_limit),
        ),
    )(xf)
    return out.reshape(B, C, H, W)


def _reference_box_blur(x, kernel_size, border_type="reflect"):
    """Pure-JAX reference (jnp.pad + shifted-sum) for correctness checks."""
    B, C, H, W = x.shape
    ky, kx = kernel_size
    ph_lo, ph_hi = ky - 1 - ky // 2, ky // 2
    pw_lo, pw_hi = kx - 1 - kx // 2, kx // 2
    xp = jnp.pad(
        x.astype(jnp.float32),
        ((0, 0), (0, 0), (ph_lo, ph_hi), (pw_lo, pw_hi)),
        mode=_BORDER_TO_PAD_MODE[border_type],
    )
    acc = jnp.zeros((B, C, H, W), jnp.float32)
    for i in range(ky):
        for j in range(kx):
            acc = acc + xp[:, :, i:i + H, j:j + W]
    res = acc / (ky * kx)
    if jnp.issubdtype(x.dtype, jnp.integer):
        res = jnp.round(res)  # same convention as the Pallas kernel
    return res.astype(x.dtype)


if __name__ == "__main__":
    key = jax.random.PRNGKey(0)
    x = jax.random.uniform(key, (2, 4, 16, 16), dtype=jnp.float32)

    # Default kornia configuration.
    y = jax.block_until_ready(box_blur(x, (3, 3), border_type="reflect",
                                       normalized=True))
    assert y.shape == x.shape and y.dtype == x.dtype
    y_ref = _reference_box_blur(x, (3, 3), border_type="reflect")
    assert jnp.allclose(y, y_ref, atol=1e-5, rtol=1e-5)

    # Exercise the other border modes through the same fused code path.
    for bt in ("replicate", "circular", "constant"):
        yb = jax.block_until_ready(box_blur(x, (3, 3), border_type=bt))
        yb_ref = _reference_box_blur(x, (3, 3), border_type=bt)
        assert jnp.allclose(yb, yb_ref, atol=1e-5, rtol=1e-5)

    # Asymmetric kernel exercises the asymmetric front/rear padding split.
    y2 = jax.block_until_ready(box_blur(x, (5, 3), border_type="reflect"))
    y2_ref = _reference_box_blur(x, (5, 3), border_type="reflect")
    assert jnp.allclose(y2, y2_ref, atol=1e-5, rtol=1e-5)

    print("KERNEL_OK")
</pallas_src>

<mosaic_0001>
module attributes {stable_mosaic.version = 11 : i64} {
  func.func @_box_blur_kernel(%arg0: i32, %arg1: memref<4x16x16xf32, #tpu.memory_space<vmem>>, %arg2: memref<4x16x16xf32, #tpu.memory_space<vmem>>, %arg3: memref<4x18x18xf32, #tpu.memory_space<vmem>>) attributes {dimension_semantics = [#tpu.dimension_semantics<parallel>], iteration_bounds = array<i64: 2>, scalar_prefetch = 0 : i64, scratch_operands = 1 : i64, tpu.core_type = #tpu.core_type<tc>, window_params = [{transform_indices = @transform_0, window_bounds = array<i64: 4, 16, 16>}, {transform_indices = @transform_1, window_bounds = array<i64: 4, 16, 16>}]} {
    %c0 = arith.constant 0 : index
    %c0_0 = arith.constant 0 : index
    %c0_1 = arith.constant 0 : index
    %0 = vector.load %arg1[%c0, %c0_0, %c0_1] : memref<4x16x16xf32, #tpu.memory_space<vmem>>, vector<4x16x16xf32>
    %c0_2 = arith.constant 0 : index
    %c1 = arith.constant 1 : index
    %c1_3 = arith.constant 1 : index
    %1 = vector.load %arg3[%c0_2, %c1, %c1_3] : memref<4x18x18xf32, #tpu.memory_space<vmem>>, vector<4x16x16xf32>
    tpu.vector_store %arg3[%c0_2, %c1, %c1_3], %0 {strides = array<i32>} : memref<4x18x18xf32, #tpu.memory_space<vmem>>, vector<4x16x16xf32>,
    %c0_4 = arith.constant 0 : index
    %c0_5 = arith.constant 0 : index
    %c1_6 = arith.constant 1 : index
    %2 = vector.load %arg1[%c0_4, %c0_5, %c1_6] : memref<4x16x16xf32, #tpu.memory_space<vmem>>, vector<4x16x1xf32>
    %c0_7 = arith.constant 0 : index
    %c1_8 = arith.constant 1 : index
    %c0_9 = arith.constant 0 : index
    %3 = vector.load %arg3[%c0_7, %c1_8, %c0_9] : memref<4x18x18xf32, #tpu.memory_space<vmem>>, vector<4x16x1xf32>
    tpu.vector_store %arg3[%c0_7, %c1_8, %c0_9], %2 {strides = array<i32>} : memref<4x18x18xf32, #tpu.memory_space<vmem>>, vector<4x16x1xf32>,
    %c0_10 = arith.constant 0 : index
    %c0_11 = arith.constant 0 : index
    %c14 = arith.constant 14 : index
    %4 = vector.load %arg1[%c0_10, %c0_11, %c14] : memref<4x16x16xf32, #tpu.memory_space<vmem>>, vector<4x16x1xf32>
    %c0_12 = arith.constant 0 : index
    %c1_13 = arith.constant 1 : index
    %c17 = arith.constant 17 : index
    %5 = vector.load %arg3[%c0_12, %c1_13, %c17] : memref<4x18x18xf32, #tpu.memory_space<vmem>>, vector<4x16x1xf32>
    tpu.vector_store %arg3[%c0_12, %c1_13, %c17], %4 {strides = array<i32>} : memref<4x18x18xf32, #tpu.memory_space<vmem>>, vector<4x16x1xf32>,
    %c0_14 = arith.constant 0 : index
    %c2 = arith.constant 2 : index
    %c0_15 = arith.constant 0 : index
    %6 = vector.load %arg3[%c0_14, %c2, %c0_15] : memref<4x18x18xf32, #tpu.memory_space<vmem>>, vector<4x1x18xf32>
    %c0_16 = arith.constant 0 : index
    %c0_17 = arith.constant 0 : index
    %c0_18 = arith.constant 0 : index
    %7 = vector.load %arg3[%c0_16, %c0_17, %c0_18] : memref<4x18x18xf32, #tpu.memory_space<vmem>>, vector<4x1x18xf32>
    tpu.vector_store %arg3[%c0_16, %c0_17, %c0_18], %6 {strides = array<i32>} : memref<4x18x18xf32, #tpu.memory_space<vmem>>, vector<4x1x18xf32>,
    %c0_19 = arith.constant 0 : index
    %c15 = arith.constant 15 : index
    %c0_20 = arith.constant 0 : index
    %8 = vector.load %arg3[%c0_19, %c15, %c0_20] : memref<4x18x18xf32, #tpu.memory_space<vmem>>, vector<4x1x18xf32>
    %c0_21 = arith.constant 0 : index
    %c17_22 = arith.constant 17 : index
    %c0_23 = arith.constant 0 : index
    %9 = vector.load %arg3[%c0_21, %c17_22, %c0_23] : memref<4x18x18xf32, #tpu.memory_space<vmem>>, vector<4x1x18xf32>
    tpu.vector_store %arg3[%c0_21, %c17_22, %c0_23], %8 {strides = array<i32>} : memref<4x18x18xf32, #tpu.memory_space<vmem>>, vector<4x1x18xf32>,
    %c0_24 = arith.constant 0 : index
    %c0_25 = arith.constant 0 : index
    %c0_26 = arith.constant 0 : index
    %10 = vector.load %arg3[%c0_24, %c0_25, %c0_26] : memref<4x18x18xf32, #tpu.memory_space<vmem>>, vector<4x18x16xf32>
    %c0_27 = arith.constant 0 : index
    %c0_28 = arith.constant 0 : index
    %c1_29 = arith.constant 1 : index
    %11 = vector.load %arg3[%c0_27, %c0_28, %c1_29] : memref<4x18x18xf32, #tpu.memory_space<vmem>>, vector<4x18x16xf32>
    %12 = arith.addf %10, %11 : vector<4x18x16xf32>
    %c0_30 = arith.constant 0 : index
    %c0_31 = arith.constant 0 : index
    %c2_32 = arith.constant 2 : index
    %13 = vector.load %arg3[%c0_30, %c0_31, %c2_32] : memref<4x18x18xf32, #tpu.memory_space<vmem>>, vector<4x18x16xf32>
    %14 = arith.addf %12, %13 : vector<4x18x16xf32>
    %15 = vector.extract_strided_slice %14 {offsets = [0, 0, 0], sizes = [4, 16, 16], strides = [1, 1, 1]} : vector<4x18x16xf32> to vector<4x16x16xf32>
    %16 = vector.extract_strided_slice %14 {offsets = [0, 1, 0], sizes = [4, 16, 16], strides = [1, 1, 1]} : vector<4x18x16xf32> to vector<4x16x16xf32>
    %17 = arith.addf %15, %16 : vector<4x16x16xf32>
    %18 = vector.extract_strided_slice %14 {offsets = [0, 2, 0], sizes = [4, 16, 16], strides = [1, 1, 1]} : vector<4x18x16xf32> to vector<4x16x16xf32>
    %19 = arith.addf %17, %18 : vector<4x16x16xf32>
    %cst = arith.constant 0.111111112 : f32
    %20 = vector.broadcast %cst : f32 to vector<4x16x16xf32>
    %21 = arith.mulf %19, %20 : vector<4x16x16xf32>
    %c0_33 = arith.constant 0 : index
    %c0_34 = arith.constant 0 : index
    %c0_35 = arith.constant 0 : index
    %22 = vector.load %arg2[%c0_33, %c0_34, %c0_35] : memref<4x16x16xf32, #tpu.memory_space<vmem>>, vector<4x16x16xf32>
    tpu.vector_store %arg2[%c0_33, %c0_34, %c0_35], %21 {strides = array<i32>} : memref<4x16x16xf32, #tpu.memory_space<vmem>>, vector<4x16x16xf32>,
    return
  }
  func.func @transform_0(%arg0: i32) -> (i32, i32, i32) {
    %c0_i32 = arith.constant 0 : i32
    %c0_i32_0 = arith.constant 0 : i32
    %c0_i32_1 = arith.constant 0 : i32
    return %arg0, %c0_i32, %c0_i32_0 : i32, i32, i32
  }
  func.func @transform_1(%arg0: i32) -> (i32, i32, i32) {
    %c0_i32 = arith.constant 0 : i32
    %c0_i32_0 = arith.constant 0 : i32
    %c0_i32_1 = arith.constant 0 : i32
    return %arg0, %c0_i32, %c0_i32_0 : i32, i32, i32
  }
}

</mosaic_0001>

<bundles_post_ra>
// kernel: tpu_custom_call.1
= control target key start
LH: loop header
LB: loop body
LE: loop exit
PB: predicated region body
PF: predicated region fallthrough
CT: control target
= control target key end

     0   :  { %6 = vsyncpa [#allocation4], 0  ;;  %s1118_s0 = inlined_call_operand.hbm [shape: f32[8,16,16], index: 0, kind: input, shape index: {}]   ;;  %s1119_s1 = inlined_call_operand.hbm [shape: f32[8,16,16], index: 1, kind: output, shape index: {}]  }
   0x1   :  { %8 = vsyncpa [#allocation4 + $0x1], 0 }
   0x2   :  { %9 = vsyncpa [#allocation5], 0 }
   0x3   :  { %11 = vsyncpa [#allocation5 + $0x1], 0  ;;  %s805_s6 = smov 0   ;;  %s807_s7 = smov 0  }
   0x4   :  { %s809_s8 = smov 0   ;;  %s811_s9 = smov 0  }
   0x5 LB: > { %s826_s10 = sadd.s32 4294967295, %s783_s9   ;;  %s613_s11 = sadd.s32 4294967294, %s783_s9   ;;  %s783_s9 = sphi %s811_s9, %s1132_s9   ;;  %s779_s8 = sphi %s809_s8, %s1131_s8   ;;  %s775_s7 = sphi %s807_s7, %s1130_s7   ;;  %s771_s6 = sphi %s805_s6, %s1129_s6  }
   0x6   : > { %s830_s12 = sadd.s32 1, %s783_s9   ;;  %s24_s13 = sadd.s32 1, %s779_s8 }
   0x7   : > { %s21_s14 = ssub.s32 %s783_s9, %s830_s12  ;;  %p31_p0 = scmp.ne.s32.totalorder %s779_s8, %s775_s7 }
   0x8   : > { %p22_p1 = scmp.eq.s32.totalorder %s21_s14, 0  ;;  %p32_p2 = scmp.eq.s32.totalorder %s783_s9, 0 }
   0x9   : > { %p37_p3 = scmp.ne.s32.totalorder %s775_s7, %s771_s6  ;;  %p38_p4 = scmp.eq.s32.totalorder %s826_s10, 0 }
   0xa   : > { %s842_s15 = scalar_select %p22_p1, %s779_s8, %s24_s13  }
   0xb   : > { %p844_p5 = por %p32_p2, %p31_p0  ;;  %p848_p6 = por %p38_p4, %p37_p3 }
   0xc   : > { %p61_p7 = scmp.eq.s32.totalorder %s826_s10, 1  ;;  %p67_p8 = scmp.eq.s32.totalorder %s613_s11, 1 }
   0xd   : > { %p645_p10 = scmp.lt.s32.totalorder %s783_s9, 2  ;;  %s87_s20 = sand.u32 1, %s779_s8  }
   0xe   : > { %p855_p11 = por %p61_p7, %p31_p0  ;;  %p859_p12 = por %p67_p8, %p37_p3 }
   0xf   : > { %s630_s21 = sshll.u32 %s783_s9, 10  ;;  %s616_s22 = sshll.u32 %s87_s20, 6 }
  0x10   : > { %s1123_s18 = scalar_select %p855_p11, 1, 0 }
  0x11   : > { %s1124_s19 = scalar_select %p859_p12, 1, 0 }
  0x12   : > { %s868_s25 = scalar_lea.hbm %s1118_s0, %s630_s21  ;;  %s91_s26 = scalar_lea.vmem [#allocation3], %s616_s22 }
  0x13   : > { %s99_s27 = sshll.u32 %s91_s26, 4  ;;  %p872_p13 = pnand %p645_p10, %p844_p5  ;;  %s876_s27 = int_to_ptr.vmem [resolvable:$true] %s99_s27 }
  0x14   : > { %s878_s29 = scalar_lea.sflag [#allocation4], %s87_s20  ;;  %s687_s30 = scalar_lea.hbm %s868_s25, 1024 }
  0x15   : > { %p688_p0 = scmp.ne.s32.totalorder %s868_s25, %s687_s30  ;;  %p689_p1 = pneg %p872_p13 }
  0x16   : > { %s692_s4 = scalar_lea.hbm %s1118_s0, 2048  ;;  %p693_p4 = scmp.lt.u32.totalorder %s868_s25, %s1118_s0 }
  0x17   : > { %p690_p2 = pnand %p689_p1, %p688_p0  ;;  %p694_p5 = scmp.lt.u32.totalorder %s692_s4, %s687_s30 }
  0x18   : > { %p696_p8 = scmp.lt.u32.totalorder %s687_s30, %s868_s25 }
  0x19   : > { %p691_p3 = pneg %p690_p2  ;;  %p695_p7 = por %p694_p5, %p693_p4 }
  0x1b   : > { %p697_p10 = por %p696_p8, %p695_p7 }
  0x1d   : > { %p698_p9 = pnand %p697_p10, %p691_p3 }
  0x1f   : > { %701 = shalt.err (!%p698_p9)
}
  0x20   : > { %s702_s13 = scalar_lea.vmem %s876_s27, 1024  ;;  %s785_s14 = smov [#allocation3]  }
  0x21   : > { %p703_p0 = scmp.ne.s32.totalorder %s876_s27, %s702_s13  ;;  %s707_s16 = sshll.u32 %s785_s14, 4  ;;  %s708_s16 = int_to_ptr.vmem [resolvable:$false] %s707_s16 }
  0x22   : > { %s709_s20 = scalar_lea.vmem %s708_s16, 2048  ;;  %p710_p11 = scmp.lt.s32.totalorder %s876_s27, %s708_s16 }
  0x23   : > { %p705_p2 = pnand %p703_p0, %p689_p1  ;;  %p711_p4 = scmp.lt.s32.totalorder %s709_s20, %s702_s13 }
  0x25   : > { %p706_p12 = pneg %p705_p2  ;;  %p712_p5 = por %p711_p4, %p710_p11 }
  0x27   : > { %p713_p7 = pnand %p712_p5, %p706_p12 }
  0x29   : > { %716 = shalt.err (!%p713_p7)
}
  0x2a   : > { %s786_s21 = smov 128   ;;  %s787_s22 = smov 8  }
  0x2b   : > { %640 = dma.hbm_to_vmem [thread:$0]  (!%p872_p13), %s868_s25, 1024, %s876_s27, %s878_s29, %s786_s21, %s786_s21, %s787_s22  }
  0x2c   : > { %p620_p9 = scmp.ge.s32.totalorder %s783_s9, 1  ;;  %p107_p1 = scmp.lt.s32.totalorder %s783_s9, 3 }
  0x2e   : > { %p108_p3 = pnand %p620_p9, %p107_p1 }
  0x2f   : > { %s909_s23 = sand.u32 (!%p108_p3), 1, %s775_s7  }
  0x30   : > { %111 = sbr.rel (%p108_p3) target bundleno = 406 (0x196), region = 24  ;;  %s621_s24 = sshll.u32 (!%p108_p3), %s909_s23, 6 }
  0x31   : > { %s114_s26 = scalar_lea.sflag (!%p108_p3), [#allocation4], %s909_s23  ;;  %s117_s30 = scalar_lea.vmem (!%p108_p3), [#allocation3], %s621_s24 }
  0x37   : > { %762 = dma.done.wait (%p848_p6), %s114_s26, 1024  }
  0x38   : > { %764 = vsyncadd (%p848_p6), %s114_s26, 4294966272  ;;  %v140_v0 = vld [vmem:[%s117_s30 + $0x10] sm:$0xff]  ;;  %v138_v1 = vld [vmem:[%s117_s30] sm:$0xff]  ;;  %s788_s25 = smov 1   ;;  %s789_s27 = smov 127   ;;  %vm178_vm0 = vcmask 138248  }
  0x39   : > { %158 = vrot.lane.b32.xlu1 %v140_v0, %s788_s25  ;;  %154 = vrot.lane.b32.xlu0 %v138_v1, %s788_s25  ;;  %v141_v2 = vld [vmem:[%s117_s30 + $0x18] sm:$0xff]  ;;  %v139_v3 = vld [vmem:[%s117_s30 + $0x8] sm:$0xff]  ;;  %s790_s17 = smov 3   ;;  %vm227_vm1 = vcmask 7168   ;;  %vm276_vm2 = vcmask 146568   ;;  %vm289_vm3 = vcmask 139264  }
  0x3a   : > { %v143_v4 = vld [vmem:[%s117_s30 + $0x28] sm:$0xff]  ;;  %v142_v5 = vld [vmem:[%s117_s30 + $0x20] sm:$0xff]  ;;  %v145_v6 = vld [vmem:[%s117_s30 + $0x38] sm:$0xff]  ;;  %s791_s28 = smov 126   ;;  %vm434_vm4 = vcmask 1046528   ;;  %vm471_vm5 = vcmask 1045504  }
  0x3b   : > { %v144_v7 = vld [vmem:[%s117_s30 + $0x30] sm:$0xff]  ;;  %vm516_vm6 = vcmask 130048   ;;  %s1034_s29 = scalar_lea.vmem [#allocation6], %s621_s24  ;;  %s632_s2 = sshll.u32 %s826_s10, 10 }
  0x3c   : > { %s540_s3 = sshll.u32 %s1034_s29, 4  ;;  %s1068_s11 = scalar_lea.hbm %s1119_s1, %s632_s2  ;;  %s1070_s3 = int_to_ptr.vmem [resolvable:$true] %s540_s3 }
  0x3d   : > { %160 = vrot.lane.b32.xlu1 %v141_v2, %s788_s25  ;;  %156 = vrot.lane.b32.xlu0 %v139_v3, %s788_s25  ;;  %s526_s10 = scalar_lea.sflag [#allocation5], %s909_s23  ;;  %s717_s13 = scalar_lea.vmem %s1070_s3, 1024 }
  0x3e   : > { %p718_p6 = scmp.ne.s32.totalorder %s1070_s3, %s717_s13  ;;  %p1126_p11 = scmp.ne.s32.totalorder %s1123_s18, 0 }
  0x3f   : > { %s792_s14 = smov [#allocation6]  }
  0x40   : > { %p719_p12 = pnand %p718_p6, %p1126_p11  ;;  %s721_s16 = sshll.u32 %s792_s14, 4  ;;  %s722_s16 = int_to_ptr.vmem [resolvable:$false] %s721_s16 }
  0x41   : > { %164 = vrot.lane.b32.xlu1 %v143_v4, %s788_s25  ;;  %162 = vrot.lane.b32.xlu0 %v142_v5, %s788_s25  ;;  %s723_s20 = scalar_lea.vmem %s722_s16, 2048  ;;  %p724_p8 = scmp.lt.s32.totalorder %s1070_s3, %s722_s16 }
  0x42   : > { %p720_p13 = pneg %p719_p12  ;;  %p725_p10 = scmp.lt.s32.totalorder %s723_s20, %s717_s13 }
  0x44   : > { %p726_p0 = por %p725_p10, %p724_p8 }
  0x45   : > { %168 = vrot.lane.b32.xlu1 %v145_v6, %s788_s25  ;;  %166 = vrot.lane.b32.xlu0 %v144_v7, %s788_s25 }
  0x46   : > { %p727_p2 = pnand %p726_p0, %p720_p13 }
  0x49   : > { %205 = vrot.lane.b32.xlu1 %v139_v3, %s789_s27  ;;  %203 = vrot.lane.b32.xlu0 %v138_v1, %s789_s27 }
  0x4d   : > { %209 = vrot.lane.b32.xlu1 %v141_v2, %s789_s27  ;;  %207 = vrot.lane.b32.xlu0 %v140_v0, %s789_s27 }
  0x51   : > { %213 = vrot.lane.b32.xlu1 %v143_v4, %s789_s27  ;;  %211 = vrot.lane.b32.xlu0 %v142_v5, %s789_s27 }
  0x55   : > { %217 = vrot.lane.b32.xlu1 %v145_v6, %s789_s27  ;;  %215 = vrot.lane.b32.xlu0 %v144_v7, %s789_s27 }
  0x59   : > { %254 = vrot.lane.b32.xlu1 %v139_v3, %s790_s17  ;;  %252 = vrot.lane.b32.xlu0 %v138_v1, %s790_s17 }
  0x5d   : > { %258 = vrot.lane.b32.xlu1 %v141_v2, %s790_s17  ;;  %256 = vrot.lane.b32.xlu0 %v140_v0, %s790_s17 }
  0x61   : > { %262 = vrot.lane.b32.xlu1 %v143_v4, %s790_s17  ;;  %260 = vrot.lane.b32.xlu0 %v142_v5, %s790_s17 }
  0x65   : > { %266 = vrot.lane.b32.xlu1 %v145_v6, %s790_s17  ;;  %264 = vrot.lane.b32.xlu0 %v144_v7, %s790_s17 }
  0xab   : > { %v159_v8 = vpop.permute.xlu1 %158  ;;  %v155_v9 = vpop.permute.xlu0 %154 }
  0xac   : > { %181 = vst.msk [vmem:[#allocation2 + $0x19] sm:$0xff] %vm178_vm0, %v159_v8  ;;  %179 = vst.msk [vmem:[#allocation2 + $0x1] sm:$0xff] %vm178_vm0, %v155_v9 }
  0xaf   : > { %v161_v10 = vpop.permute.xlu1 %160  ;;  %v157_v11 = vpop.permute.xlu0 %156 }
  0xb0   : > { %182 = vst.msk [vmem:[#allocation2 + $0x21] sm:$0xff] %vm178_vm0, %v161_v10  ;;  %180 = vst.msk [vmem:[#allocation2 + $0x9] sm:$0xff] %vm178_vm0, %v157_v11 }
  0xb3   : > { %v165_v12 = vpop.permute.xlu1 %164  ;;  %v163_v13 = vpop.permute.xlu0 %162 }
  0xb4   : > { %184 = vst.msk [vmem:[#allocation2 + $0x39] sm:$0xff] %vm178_vm0, %v165_v12  ;;  %183 = vst.msk [vmem:[#allocation2 + $0x31] sm:$0xff] %vm178_vm0, %v163_v13 }
  0xb7   : > { %v169_v14 = vpop.permute.xlu1 %168  ;;  %v167_v15 = vpop.permute.xlu0 %166 }
  0xb8   : > { %186 = vst.msk [vmem:[#allocation2 + $0x51] sm:$0xff] %vm178_vm0, %v169_v14  ;;  %185 = vst.msk [vmem:[#allocation2 + $0x49] sm:$0xff] %vm178_vm0, %v167_v15 }
  0xbb   : > { %v206_v16 = vpop.permute.xlu1 %205  ;;  %v204_v17 = vpop.permute.xlu0 %203 }
  0xbc   : > { %229 = vst.msk [vmem:[#allocation2 + $0x9] sm:$0xff] %vm227_vm1, %v206_v16  ;;  %228 = vst.msk [vmem:[#allocation2 + $0x1] sm:$0xff] %vm227_vm1, %v204_v17 }
  0xbf   : > { %v210_v18 = vpop.permute.xlu1 %209  ;;  %v208_v19 = vpop.permute.xlu0 %207 }
  0xc0   : > { %231 = vst.msk [vmem:[#allocation2 + $0x21] sm:$0xff] %vm227_vm1, %v210_v18  ;;  %230 = vst.msk [vmem:[#allocation2 + $0x19] sm:$0xff] %vm227_vm1, %v208_v19 }
  0xc3   : > { %v214_v20 = vpop.permute.xlu1 %213  ;;  %v212_v21 = vpop.permute.xlu0 %211 }
  0xc4   : > { %233 = vst.msk [vmem:[#allocation2 + $0x39] sm:$0xff] %vm227_vm1, %v214_v20  ;;  %232 = vst.msk [vmem:[#allocation2 + $0x31] sm:$0xff] %vm227_vm1, %v212_v21 }
  0xc7   : > { %v218_v22 = vpop.permute.xlu1 %217  ;;  %v216_v23 = vpop.permute.xlu0 %215 }
  0xc8   : > { %235 = vst.msk [vmem:[#allocation2 + $0x51] sm:$0xff] %vm227_vm1, %v218_v22  ;;  %234 = vst.msk [vmem:[#allocation2 + $0x49] sm:$0xff] %vm227_vm1, %v216_v23 }
  0xcb   : > { %v255_v24 = vpop.permute.xlu1 %254  ;;  %v253_v25 = vpop.permute.xlu0 %252 }
  0xcc   : > { %278 = vst.msk [vmem:[#allocation2 + $0x9] sm:$0xff] %vm276_vm2, %v255_v24  ;;  %277 = vst.msk [vmem:[#allocation2 + $0x1] sm:$0xff] %vm276_vm2, %v253_v25 }
  0xcf   : > { %v259_v26 = vpop.permute.xlu1 %258  ;;  %v257_v27 = vpop.permute.xlu0 %256 }
  0xd0   : > { %280 = vst.msk [vmem:[#allocation2 + $0x21] sm:$0xff] %vm276_vm2, %v259_v26  ;;  %279 = vst.msk [vmem:[#allocation2 + $0x19] sm:$0xff] %vm276_vm2, %v257_v27 }
  0xd3   : > { %v294_v28 = vld [vmem:[#allocation2 + $0xf] sm:$0x1]  ;;  %v285_v29 = vld [vmem:[#allocation2 + $0x2] sm:$0x1]  ;;  %v263_v30 = vpop.permute.xlu1 %262  ;;  %v261_v31 = vpop.permute.xlu0 %260 }
  0xd4   : > { %v947_v32 = vld [vmem:[#allocation2 + $0x8] sm:$0xff]  ;;  %282 = vst.msk [vmem:[#allocation2 + $0x39] sm:$0xff] %vm276_vm2, %v263_v30  ;;  %281 = vst.msk [vmem:[#allocation2 + $0x31] sm:$0xff] %vm276_vm2, %v261_v31 }
  0xd5   : > { %328 = vrot.lane.b32.xlu1 %v947_v32, %s789_s27  ;;  %290 = vst.msk [vmem:[#allocation2] sm:$0x1] %vm289_vm3, %v285_v29  ;;  %298 = vst.msk [vmem:[#allocation2 + $0x11] sm:$0x1] %vm289_vm3, %v294_v28 }
  0xd7   : > { %v295_v33 = vld [vmem:[#allocation2 + $0x27] sm:$0x1]  ;;  %v286_v34 = vld [vmem:[#allocation2 + $0x1a] sm:$0x1]  ;;  %v267_v35 = vpop.permute.xlu1 %266  ;;  %v265_v36 = vpop.permute.xlu0 %264 }
  0xd8   : > { %v306_v37 = vld [vmem:[#allocation2 + $0x20] sm:$0xff]  ;;  %284 = vst.msk [vmem:[#allocation2 + $0x51] sm:$0xff] %vm276_vm2, %v267_v35  ;;  %283 = vst.msk [vmem:[#allocation2 + $0x49] sm:$0xff] %vm276_vm2, %v265_v36 }
  0xd9   : > { %334 = vrot.lane.b32.xlu0 %v306_v37, %s789_s27  ;;  %291 = vst.msk [vmem:[#allocation2 + $0x18] sm:$0x1] %vm289_vm3, %v286_v34  ;;  %299 = vst.msk [vmem:[#allocation2 + $0x29] sm:$0x1] %vm289_vm3, %v295_v33 }
  0xdb   : > { %v296_v38 = vld [vmem:[#allocation2 + $0x3f] sm:$0x1]  ;;  %v287_v39 = vld [vmem:[#allocation2 + $0x32] sm:$0x1] }
  0xdc   : > { %v960_v40 = vld [vmem:[#allocation2 + $0x38] sm:$0xff]  ;;  %292 = vst.msk [vmem:[#allocation2 + $0x30] sm:$0x1] %vm289_vm3, %v287_v39  ;;  %300 = vst.msk [vmem:[#allocation2 + $0x41] sm:$0x1] %vm289_vm3, %v296_v38  ;;  %v302_v45 = vld [vmem:[#allocation2] sm:$0xff] }
  0xdd   : > { %340 = vrot.lane.b32.xlu1 %v960_v40, %s789_s27  ;;  %v304_v47 = vld [vmem:[#allocation2 + $0x10] sm:$0x3] }
  0xdf   : > { %v297_v41 = vld [vmem:[#allocation2 + $0x57] sm:$0x1]  ;;  %v288_v42 = vld [vmem:[#allocation2 + $0x4a] sm:$0x1] }
  0xe0   : > { %v966_v43 = vld [vmem:[#allocation2 + $0x50] sm:$0xff]  ;;  %293 = vst.msk [vmem:[#allocation2 + $0x48] sm:$0x1] %vm289_vm3, %v288_v42  ;;  %301 = vst.msk [vmem:[#allocation2 + $0x59] sm:$0x1] %vm289_vm3, %v297_v41  ;;  %v305_v44 = vld [vmem:[#allocation2 + $0x18] sm:$0xff] }
  0xe1   : > { %376 = vrot.lane.b32.xlu1 %v947_v32, %s791_s28  ;;  %346 = vrot.lane.b32.xlu0 %v966_v43, %s789_s27  ;;  %v307_v46 = vld [vmem:[#allocation2 + $0x28] sm:$0x3] }
  0xe3   : > { %v981_v48 = vld [vmem:[#allocation2 + $0x30] sm:$0xff]  ;;  %v989_v50 = vld [vmem:[#allocation2 + $0x40] sm:$0x3] }
  0xe5   : > { %388 = vrot.lane.b32.xlu1 %v960_v40, %s791_s28  ;;  %382 = vrot.lane.b32.xlu0 %v306_v37, %s791_s28 }
  0xe7   : > { %v983_v49 = vld [vmem:[#allocation2 + $0x48] sm:$0xff]  ;;  %v991_v51 = vld [vmem:[#allocation2 + $0x58] sm:$0x3] }
  0xe9   : > { %332 = vrot.lane.b32.xlu1 %v305_v44, %s789_s27  ;;  %326 = vrot.lane.b32.xlu0 %v302_v45, %s789_s27 }
  0xed   : > { %336 = vrot.lane.b32.xlu1 %v307_v46, %s789_s27  ;;  %330 = vrot.lane.b32.xlu0 %v304_v47, %s789_s27 }
  0xf1   : > { %338 = vrot.lane.b32.xlu0 %v981_v48, %s789_s27  ;;  %344 = vrot.lane.b32.xlu1 %v983_v49, %s789_s27 }
  0xf5   : > { %342 = vrot.lane.b32.xlu0 %v989_v50, %s789_s27  ;;  %348 = vrot.lane.b32.xlu1 %v991_v51, %s789_s27 }
  0xf9   : > { %374 = vrot.lane.b32.xlu0 %v302_v45, %s791_s28  ;;  %380 = vrot.lane.b32.xlu1 %v305_v44, %s791_s28 }
  0xfd   : > { %378 = vrot.lane.b32.xlu0 %v304_v47, %s791_s28  ;;  %384 = vrot.lane.b32.xlu1 %v307_v46, %s791_s28 }
 0x101   : > { %386 = vrot.lane.b32.xlu0 %v981_v48, %s791_s28  ;;  %392 = vrot.lane.b32.xlu1 %v983_v49, %s791_s28 }
 0x105   : > { %390 = vrot.lane.b32.xlu0 %v989_v50, %s791_s28  ;;  %396 = vrot.lane.b32.xlu1 %v991_v51, %s791_s28 }
 0x109   : > { %394 = vrot.lane.b32.xlu0 %v966_v43, %s791_s28 }
 0x147   : > { %v329_v52 = vpop.permute.xlu1 %328 }
 0x148   : > { %v363_v1 = vadd.f32 %v329_v52, %v947_v32 }
 0x14b   : > { %v335_v53 = vpop.permute.xlu0 %334 }
 0x14c   : > { %v366_v2 = vadd.f32 %v335_v53, %v306_v37 }
 0x14f   : > { %v341_v54 = vpop.permute.xlu1 %340 }
 0x150   : > { %v369_v13 = vadd.f32 %v341_v54, %v960_v40 }
 0x153   : > { %v377_v55 = vpop.permute.xlu1 %376  ;;  %v1011_v56 = vpop.permute.xlu0 %346 }
 0x154   : > { %v1014_v5 = vadd.f32 %v377_v55, %v363_v1 }
 0x156   : > { %v436_v14 = vrot.slane %v1014_v5, 1  ;;  %v473_v20 = vrot.slane %v1014_v5, 2 }
 0x157   : > { %v389_v57 = vpop.permute.xlu1 %388  ;;  %v383_v58 = vpop.permute.xlu0 %382 }
 0x158   : > { %v414_v6 = vadd.f32 %v383_v58, %v366_v2  ;;  %v1019_v25 = vadd.f32 %v389_v57, %v369_v13 }
 0x15a   : > { %v441_v15 = vrot.slane %v414_v6, 1  ;;  %v478_v26 = vrot.slane %v414_v6, 2  ;;  %v446_v42 = vrot.slane %v1019_v25, 1 }
 0x15b   : > { %v333_v59 = vpop.permute.xlu1 %332  ;;  %v327_v60 = vpop.permute.xlu0 %326 }
 0x15c   : > { %v365_v7 = vadd.f32 %v333_v59, %v305_v44  ;;  %v362_v8 = vadd.f32 %v327_v60, %v302_v45 }
 0x15f   : > { %v337_v61 = vpop.permute.xlu1 %336  ;;  %v331_v62 = vpop.permute.xlu0 %330 }
 0x160   : > { %v367_v21 = vadd.f32 %v337_v61, %v307_v46  ;;  %v364_v22 = vadd.f32 %v331_v62, %v304_v47  ;;  %v483_v62 = vrot.slane %v1019_v25, 2 }
 0x163   : > { %v345_v63 = vpop.permute.xlu1 %344  ;;  %v339_v0 = vpop.permute.xlu0 %338 }
 0x164   : > { %v368_v33 = vadd.f32 %v339_v0, %v981_v48  ;;  %v371_v47 = vadd.f32 %v345_v63, %v983_v49 }
 0x167   : > { %v349_v3 = vpop.permute.xlu1 %348  ;;  %v343_v4 = vpop.permute.xlu0 %342 }
 0x168   : > { %v373_v54 = vadd.f32 %v349_v3, %v991_v51  ;;  %v370_v55 = vadd.f32 %v343_v4, %v989_v50 }
 0x16b   : > { %v381_v9 = vpop.permute.xlu1 %380  ;;  %v375_v10 = vpop.permute.xlu0 %374 }
 0x16c   : > { %v413_v11 = vadd.f32 %v381_v9, %v365_v7  ;;  %v410_v12 = vadd.f32 %v375_v10, %v362_v8 }
 0x16e   : > { %v440_v16 = vrot.slane %v413_v11, 1  ;;  %v477_v17 = vrot.slane %v413_v11, 2  ;;  %v435_v18 = vrot.slane %v410_v12, 1  ;;  %v472_v19 = vrot.slane %v410_v12, 2 }
 0x16f   : > { %v385_v23 = vpop.permute.xlu1 %384  ;;  %v379_v24 = vpop.permute.xlu0 %378 }
 0x170   : > { %v442_v27 = vsel %vm434_vm4, %v440_v16, %v441_v15  ;;  %v437_v28 = vsel %vm434_vm4, %v435_v18, %v436_v14  ;;  %v415_v31 = vadd.f32 %v385_v23, %v367_v21  ;;  %v412_v32 = vadd.f32 %v379_v24, %v364_v22 }
 0x171   : > { %v465_v29 = vadd.f32 %v442_v27, %v413_v11  ;;  %v463_v30 = vadd.f32 %v437_v28, %v410_v12  ;;  %v479_v34 = vsel %vm471_vm5, %v477_v17, %v478_v26  ;;  %v474_v35 = vsel %vm471_vm5, %v472_v19, %v473_v20 }
 0x172   : > { %v443_v38 = vrot.slane %v415_v31, 1  ;;  %v480_v39 = vrot.slane %v415_v31, 2  ;;  %v438_v44 = vrot.slane %v412_v32, 1  ;;  %v475_v45 = vrot.slane %v412_v32, 2 }
 0x173   : > { %v502_v36 = vadd.f32 %v479_v34, %v465_v29  ;;  %v500_v37 = vadd.f32 %v474_v35, %v463_v30  ;;  %v393_v40 = vpop.permute.xlu1 %392  ;;  %v387_v41 = vpop.permute.xlu0 %386 }
 0x174   : > { %v416_v46 = vadd.f32 %v387_v41, %v368_v33  ;;  %v444_v53 = vsel %vm434_vm4, %v441_v15, %v443_v38  ;;  %v439_v58 = vsel %vm434_vm4, %v436_v14, %v438_v44  ;;  %v481_v49 = vsel %vm471_vm5, %v478_v26, %v480_v39 }
 0x175   : > { %v510_v48 = vmul.f32 0.11111111, %v502_v36  ;;  %v508_v52 = vmul.f32 0.11111111, %v500_v37  ;;  %v466_v57 = vadd.f32 %v444_v53, %v414_v6  ;;  %v464_v59 = vadd.f32 %v439_v58, %v1014_v5 }
 0x176   : > { %v445_v60 = vrot.slane %v416_v46, 1  ;;  %v482_v51 = vrot.slane %v416_v46, 2  ;;  %v476_v0 = vsel %vm471_vm5, %v473_v20, %v475_v45  ;;  %v419_v3 = vadd.f32 %v393_v40, %v371_v47 }
 0x177   : > { %519 = vst.msk [vmem:[%s1034_s29 + $0x10] sm:$0xff] %vm516_vm6, %v510_v48  ;;  %517 = vst.msk [vmem:[%s1034_s29] sm:$0xff] %vm516_vm6, %v508_v52  ;;  %v397_v61 = vpop.permute.xlu1 %396  ;;  %v391_v50 = vpop.permute.xlu0 %390  ;;  %v503_v63 = vadd.f32 %v481_v49, %v466_v57  ;;  %v501_v2 = vadd.f32 %v476_v0, %v464_v59  ;;  %v372_v5 = vadd.f32 %v1011_v56, %v966_v43 }
 0x178   : > { %v418_v1 = vadd.f32 %v391_v50, %v370_v55  ;;  %v447_v4 = vsel %vm434_vm4, %v445_v60, %v446_v42  ;;  %v421_v6 = vadd.f32 %v397_v61, %v373_v54  ;;  %v484_v10 = vsel %vm471_vm5, %v482_v51, %v483_v62 }
 0x179   : > { %v511_v7 = vmul.f32 0.11111111, %v503_v63  ;;  %v467_v8 = vadd.f32 %v447_v4, %v416_v46  ;;  %v509_v9 = vmul.f32 0.11111111, %v501_v2  ;;  %v450_v16 = vrot.slane %v419_v3, 1 }
 0x17a   : > { %v448_v11 = vrot.slane %v418_v1, 1  ;;  %v485_v12 = vrot.slane %v418_v1, 2  ;;  %v453_v17 = vrot.slane %v421_v6, 1  ;;  %v487_v21 = vrot.slane %v419_v3, 2 }
 0x17b   : > { %v395_v13 = vpop.permute.xlu0 %394  ;;  %520 = vst.msk [vmem:[%s1034_s29 + $0x18] sm:$0xff] %vm516_vm6, %v511_v7  ;;  %v504_v14 = vadd.f32 %v484_v10, %v467_v8  ;;  %518 = vst.msk [vmem:[%s1034_s29 + $0x8] sm:$0xff] %vm516_vm6, %v509_v9  ;;  %v490_v23 = vrot.slane %v421_v6, 2 }
 0x17c   : > { %v420_v15 = vadd.f32 %v395_v13, %v372_v5  ;;  %v449_v43 = vsel %vm434_vm4, %v446_v42, %v448_v11  ;;  %v486_v22 = vsel %vm471_vm5, %v483_v62, %v485_v12 }
 0x17d   : > { %v512_v56 = vmul.f32 0.11111111, %v504_v14  ;;  %v468_v18 = vadd.f32 %v449_v43, %v1019_v25 }
 0x17e   : > { %v451_v19 = vrot.slane %v420_v15, 1  ;;  %v488_v20 = vrot.slane %v420_v15, 2 }
 0x17f   : > { %521 = vst.msk [vmem:[%s1034_s29 + $0x20] sm:$0xff] %vm516_vm6, %v512_v56  ;;  %v505_v24 = vadd.f32 %v486_v22, %v468_v18 }
 0x180   : > { %v452_v26 = vsel %vm434_vm4, %v450_v16, %v451_v19  ;;  %v454_v27 = vsel %vm434_vm4, %v451_v19, %v453_v17  ;;  %v489_v30 = vsel %vm471_vm5, %v487_v21, %v488_v20  ;;  %v491_v31 = vsel %vm471_vm5, %v488_v20, %v490_v23 }
 0x181   : > { %v469_v28 = vadd.f32 %v452_v26, %v419_v3  ;;  %v470_v29 = vadd.f32 %v454_v27, %v420_v15  ;;  %v513_v25 = vmul.f32 0.11111111, %v505_v24 }
 0x183   : > { %v506_v32 = vadd.f32 %v489_v30, %v469_v28  ;;  %v507_v33 = vadd.f32 %v491_v31, %v470_v29  ;;  %522 = vst.msk [vmem:[%s1034_s29 + $0x28] sm:$0xff] %vm516_vm6, %v513_v25 }
 0x185   : > { %v514_v34 = vmul.f32 0.11111111, %v506_v32  ;;  %v515_v35 = vmul.f32 0.11111111, %v507_v33 }
 0x187   : > { %523 = vst.msk [vmem:[%s1034_s29 + $0x30] sm:$0xff] %vm516_vm6, %v514_v34  ;;  %524 = vst.msk [vmem:[%s1034_s29 + $0x38] sm:$0xff] %vm516_vm6, %v515_v35 }
 0x188   : > { %730 = shalt.err (!%p727_p2)
}
 0x189   : > { %s731_s21 = scalar_lea.hbm %s1068_s11, 1024  ;;  %s735_s26 = scalar_lea.hbm %s1119_s1, 2048 }
 0x18a   : > { %p732_p4 = scmp.ne.s32.totalorder %s1068_s11, %s731_s21  ;;  %p736_p9 = scmp.lt.u32.totalorder %s1068_s11, %s1119_s1 }
 0x18b   : > { %p737_p1 = scmp.lt.u32.totalorder %s735_s26, %s731_s21  ;;  %p739_p6 = scmp.lt.u32.totalorder %s731_s21, %s1068_s11 }
 0x18c   : > { %p733_p5 = pnand %p732_p4, %p1126_p11 }
 0x18d   : > { %p738_p3 = por %p737_p1, %p736_p9 }
 0x18e   : > { %p734_p7 = pneg %p733_p5 }
 0x18f   : > { %p740_p12 = por %p739_p6, %p738_p3 }
 0x191   : > { %p741_p13 = pnand %p740_p12, %p734_p7 }
 0x193   : > { %744 = shalt.err (!%p741_p13)
}
 0x194   : > { %s793_s27 = smov 128   ;;  %s794_s17 = smov 8  }
 0x195   : > { %635 = dma.vmem_to_hbm [thread:$0]  (%p1126_p11), %s1070_s3, 1024, %s1068_s11, %s526_s10, %s793_s27, %s793_s27, %s794_s17  }
 0x196 PF: > { %s555_s28 = sand.u32 1, %s771_s6   ;;  %p1127_p8 = scmp.ne.s32.totalorder %s1124_s19, 0 }
 0x197   : > { %p1128_p10 = scmp.ge.s32.totalorder %s783_s9, 2  ;;  %s556_s29 = scalar_lea.sflag [#allocation5], %s555_s28 }
 0x199   : > { %p642_p0 = pnand %p1128_p10, %p1127_p8 }
 0x19b   : > { %766 = dma.done.wait (!%p642_p0), %s556_s29, 1024  }
 0x19c   : > { %768 = vsyncadd (!%p642_p0), %s556_s29, 4294966272  ;;  %p14_p2 = scmp.ge.s32.totalorder %s830_s12, 4   ;;  %s1129_s6 = smov %s775_s7 }
 0x19d   : > { %s1130_s7 = smov %s779_s8  ;;  %s1131_s8 = smov %s842_s15 }
 0x19e   : > { %s1132_s9 = smov %s830_s12  ;;  %16 = sbr.rel (!%p14_p2) target bundleno = 5 (0x5), region = 69 }
 0x1a5   :  { %561 = vsyncpa [#allocation4], 1 }
 0x1a6   :  { %563 = vsyncpa [#allocation4 + $0x1], 1 }
 0x1a7   :  { %564 = vsyncpa [#allocation5], 1 }
 0x1a8   :  { %566 = vsyncpa [#allocation5 + $0x1], 1 }

</bundles_post_ra>
